<compile_context>
chip_gen: v7x
topology: tpu7x:2x2x1
jax: 0.10.0
libtpu: 0.0.40
codegen_flags: <defaults>
</compile_context>

<pallas_src>
import functools

import jax
import jax.numpy as jnp
from jax import lax
from jax.experimental import pallas as pl
from jax.experimental.pallas import tpu as pltpu


def _vmem_budget():
    """(tile_budget_bytes, mosaic_vmem_limit_bytes) derived from this chip's VMEM."""
    try:
        cap = int(pltpu.get_tpu_info().vmem_capacity_bytes)
    except Exception:
        cap = 64 * 1024 * 1024  # conservative fallback = v7x per-core VMEM
    return int(cap * 0.45), int(cap * 0.70)


def _pick_rows(h, w, max_rows):
    """Largest th dividing h with (th*w) % 8 == 0 (sublane-exact blocks) and th <= max_rows."""
    cap = max(1, min(h, int(max_rows)))
    for d in range(cap, 0, -1):
        if h % d == 0 and ((d * w) % 8 == 0 or d == h):
            return d
    # TODO(synk): masked tail tiles for pathological (h, w); whole image always lowers.
    return h


def _stats_kernel(x_ref, w_ref, stat_ref, sum_ref, sq_ref, *, cout):
    """Pass 1: partial per-(sample, chunk, out-channel) sum / sumsq over row tiles.

    x_ref:    (1, T, Cin)        input dtype (cast to bf16 on-chip)
    w_ref:    (2, Cin, 2*Cout)   bf16, layout [kh][ci][kw*Cout + co]
    stat_ref: (1, 1, 2, Cout)    f32 partial [sum, sumsq] for this (n, chunk)
    sum_ref, sq_ref: (1, Cout)   f32 VMEM scratch accumulators
    """
    t = pl.program_id(2)

    @pl.when(t == 0)
    def _init():
        sum_ref[...] = jnp.zeros_like(sum_ref)
        sq_ref[...] = jnp.zeros_like(sq_ref)

    xb = x_ref[0].astype(jnp.bfloat16)                               # (T, Cin)
    s = jnp.zeros((1, cout), jnp.float32)
    sq = jnp.zeros((1, cout), jnp.float32)
    for kh in range(2):
        y = jnp.dot(xb, w_ref[kh], preferred_element_type=jnp.float32)   # (T, 2*Cout)
        s_full = jnp.sum(y, axis=0, keepdims=True)                   # (1, 2*Cout) full-width
        sq_full = jnp.sum(y * y, axis=0, keepdims=True)              # reductions, fold later
        s = s + s_full[:, :cout] + s_full[:, cout:]
        sq = sq + sq_full[:, :cout] + sq_full[:, cout:]
    sum_ref[...] = sum_ref[...] + s
    sq_ref[...] = sq_ref[...] + sq

    @pl.when(t == pl.num_programs(2) - 1)
    def _finalize():
        stat_ref[0, 0, 0:1, :] = sum_ref[...]
        stat_ref[0, 0, 1:2, :] = sq_ref[...]


def _norm_act_kernel(x_ref, w_ref, mi_ref, o_ref, *, th, w_img, cout, slope):
    """Pass 2: recompute matmul tile, normalize, LeakyReLU, store interleave-ready slabs.

    x_ref:  (1, T, Cin)                input dtype (T = th * w_img)
    w_ref:  (2, Cin, 2*Cout)           bf16
    mi_ref: (1, 2, 2*Cout)             f32, rows = [mean, inv_std] tiled over the kw groups
    o_ref:  (1, th, 2, w_img, 2*Cout)  out dtype; reshapes to (2H, 2W, Cout) for free
    """
    xb = x_ref[0].astype(jnp.bfloat16)                               # (T, Cin)
    mean = mi_ref[0, 0:1, :]                                         # (1, 2*Cout)
    inv = mi_ref[0, 1:2, :]                                          # (1, 2*Cout)
    for kh in range(2):
        y = jnp.dot(xb, w_ref[kh], preferred_element_type=jnp.float32)   # (T, 2*Cout)
        yn = (y - mean) * inv
        act = jnp.where(yn >= 0, yn, slope * yn)
        # Lane-dense 2*Cout-wide store; the kh axis lands where the final reshape needs it.
        o_ref[0, :, kh, :, :] = act.reshape(th, w_img, 2 * cout).astype(o_ref.dtype)


def transpose_conv_block_nhwc(x_nhwc, weight, *, eps=1e-5, slope=0.2,
                              out_dtype=jnp.float32):
    """Channels-last core.  x_nhwc: (N, H, W, Cin); weight: (Cin, Cout, 2, 2) torch layout.

    Returns (N, 2H, 2W, Cout) in `out_dtype`.  Pass out_dtype=jnp.bfloat16 when the consumer
    is a bf16 layer: pass 2 is HBM-write bound, so halving the output stream is near-linear.
    """
    N, H, W, Cin = x_nhwc.shape
    Cin_w, Cout, KH, KW = weight.shape
    assert Cin_w == Cin and KH == 2 and KW == 2
    HW = H * W

    tile_budget, vmem_limit = _vmem_budget()
    x_bytes = jnp.dtype(x_nhwc.dtype).itemsize
    o_bytes = jnp.dtype(out_dtype).itemsize
    fixed = 2 * (2 * Cin * 2 * Cout * 2) + (1 << 20)          # weight double-buffer + slack

    # Pass-2 VMEM per image row: 2x double-buffered x / out blocks + f32 temporaries.
    per_row2 = W * (2 * Cin * x_bytes + Cin * 2 + 2 * 4 * Cout * o_bytes + 3 * 2 * Cout * 4)
    th2 = _pick_rows(H, W, max(1, (tile_budget - fixed) // per_row2))
    n_tiles2 = H // th2

    # Pass 1 has no large output block; cap rows at H//2 so the chunk ('P') axis gives
    # the second TensorCore (v7x) work even at batch 1 (free on single-TC chips).
    per_row1 = W * (2 * Cin * x_bytes + Cin * 2 + 3 * 2 * Cout * 4)
    max_rows1 = max(1, (tile_budget - fixed) // per_row1)
    th1 = _pick_rows(H, W, max(1, min(max_rows1, max(1, H // 2))))
    n_tiles1 = H // th1
    P = 2 if n_tiles1 % 2 == 0 else 1
    tpc = n_tiles1 // P

    # x stays in its input dtype in HBM (no materialized bf16 copy); kernels cast on-chip.
    x_flat = x_nhwc.reshape(N, HW, Cin)
    # (Cin, Cout, kh, kw) -> (kh, Cin, kw, Cout) -> (2, Cin, 2*Cout); column = kw*Cout + co.
    w_k = jnp.transpose(weight, (2, 0, 3, 1)).reshape(2, Cin, 2 * Cout).astype(jnp.bfloat16)

    # ---- Pass 1: partial sums / sums of squares per (sample, chunk, channel). ----
    T1 = th1 * W
    stats = pl.pallas_call(
        functools.partial(_stats_kernel, cout=Cout),
        out_shape=jax.ShapeDtypeStruct((N, P, 2, Cout), jnp.float32),
        grid_spec=pltpu.PrefetchScalarGridSpec(
            num_scalar_prefetch=0,
            grid=(N, P, tpc),
            in_specs=[
                pl.BlockSpec((1, T1, Cin), lambda n, p, t: (n, p * tpc + t, 0)),
                pl.BlockSpec((2, Cin, 2 * Cout), lambda n, p, t: (0, 0, 0)),
            ],
            out_specs=pl.BlockSpec((1, 1, 2, Cout), lambda n, p, t: (n, p, 0, 0)),
            scratch_shapes=[pltpu.VMEM((1, Cout), jnp.float32),
                            pltpu.VMEM((1, Cout), jnp.float32)],
        ),
        compiler_params=pltpu.CompilerParams(
            dimension_semantics=("parallel", "parallel", "arbitrary"),
            vmem_limit_bytes=vmem_limit),
    )(x_flat, w_k)

    # Tiny finalize in the wrapper: combine chunks, mean / inv_std, tile over the kw groups.
    # TODO(synk): one-pass E[y^2]-E[y]^2 in f32 (clamped >= 0); a Welford/two-pass formulation
    # would be more robust for activations with very large means.
    inv_n = 1.0 / float(4 * HW)
    totals = jnp.sum(stats, axis=1)                            # (N, 2, Cout)
    mean = totals[:, 0] * inv_n
    var = jnp.maximum(totals[:, 1] * inv_n - mean * mean, 0.0)
    inv_std = lax.rsqrt(var + eps)
    mi = jnp.tile(jnp.stack([mean, inv_std], axis=1), (1, 1, 2))   # (N, 2, 2*Cout)

    # ---- Pass 2: recompute matmul, normalize + LeakyReLU, interleave-ready output. ----
    T2 = th2 * W
    y5 = pl.pallas_call(
        functools.partial(_norm_act_kernel, th=th2, w_img=W, cout=Cout, slope=slope),
        out_shape=jax.ShapeDtypeStruct((N, H, 2, W, 2 * Cout), out_dtype),
        grid_spec=pltpu.PrefetchScalarGridSpec(
            num_scalar_prefetch=0,
            grid=(N, n_tiles2),
            in_specs=[
                pl.BlockSpec((1, T2, Cin), lambda n, t: (n, t, 0)),
                pl.BlockSpec((2, Cin, 2 * Cout), lambda n, t: (0, 0, 0)),
                pl.BlockSpec((1, 2, 2 * Cout), lambda n, t: (n, 0, 0)),
            ],
            out_specs=pl.BlockSpec((1, th2, 2, W, 2 * Cout),
                                   lambda n, t: (n, t, 0, 0, 0)),
        ),
        compiler_params=pltpu.CompilerParams(
            dimension_semantics=("parallel", "parallel"),
            vmem_limit_bytes=vmem_limit),
    )(x_flat, w_k, mi)

    # 2x2 interleave is a pure (zero-copy) reshape thanks to the output layout:
    # (N, H, 2, W, 2*Cout) -> (N, 2H, 2W, Cout).
    return y5.reshape(N, 2 * H, 2 * W, Cout)


def transpose_conv_block(x_nchw, weight, *, eps=1e-5, slope=0.2, out_dtype=jnp.float32):
    """Drop-in NCHW wrapper matching the PyTorch module: (N, Cin, H, W) -> (N, Cout, 2H, 2W).

    Only this API shim pays NCHW<->NHWC permutes; the NHWC core is permute-free.
    """
    x_nhwc = jnp.transpose(x_nchw, (0, 2, 3, 1))
    y = transpose_conv_block_nhwc(x_nhwc, weight, eps=eps, slope=slope, out_dtype=out_dtype)
    return jnp.transpose(y, (0, 3, 1, 2))


def _reference(x_nchw, weight, *, eps=1e-5, slope=0.2):
    """Pure-JAX reference of the PyTorch forward pass (emulating the bf16 matmul inputs)."""
    N, Cin, H, W = x_nchw.shape
    _, Cout, _, _ = weight.shape
    x = x_nchw.astype(jnp.bfloat16).astype(jnp.float32)
    w = weight.astype(jnp.bfloat16).astype(jnp.float32)
    # y[n, o, 2h+kh, 2w+kw] = sum_c x[n,c,h,w] * w[c,o,kh,kw]
    y = jnp.einsum('nchw,cokl->nohwkl', x, w, precision=lax.Precision.HIGHEST)
    y = jnp.transpose(y, (0, 1, 2, 4, 3, 5)).reshape(N, Cout, 2 * H, 2 * W)
    mean = jnp.mean(y, axis=(2, 3), keepdims=True)
    var = jnp.mean((y - mean) ** 2, axis=(2, 3), keepdims=True)
    yn = (y - mean) / jnp.sqrt(var + eps)
    return jnp.where(yn >= 0, yn, slope * yn)


if __name__ == "__main__":
    key = jax.random.PRNGKey(0)
    kx, kw = jax.random.split(key)

    N, Cin, Cout, H, W = 2, 4, 8, 16, 16
    x = jax.random.normal(kx, (N, Cin, H, W), dtype=jnp.float32)
    # ConvTranspose2d weight shape: (in_chans, out_chans, kH, kW); deterministic init.
    weight = 0.1 * jax.random.normal(kw, (Cin, Cout, 2, 2), dtype=jnp.float32)

    out = transpose_conv_block(x, weight)
    out = jax.block_until_ready(out)

    ref = _reference(x, weight)
    assert out.shape == (N, Cout, 2 * H, 2 * W), out.shape
    max_err = float(jnp.max(jnp.abs(out - ref)))
    assert jnp.allclose(out, ref, atol=2e-3, rtol=2e-3), max_err

    print("KERNEL_OK")
</pallas_src>

<mosaic_0001>
module attributes {stable_mosaic.version = 11 : i64} {
  func.func @_stats_kernel(%arg0: i32, %arg1: i32, %arg2: i32, %arg3: memref<1x128x4xf32, #tpu.memory_space<vmem>>, %arg4: memref<2x4x16xbf16, #tpu.memory_space<vmem>>, %arg5: memref<1x1x2x8xf32, #tpu.memory_space<vmem>>, %arg6: memref<1x8xf32, #tpu.memory_space<vmem>>, %arg7: memref<1x8xf32, #tpu.memory_space<vmem>>) attributes {dimension_semantics = [#tpu.dimension_semantics<parallel>, #tpu.dimension_semantics<parallel>, #tpu.dimension_semantics<arbitrary>], iteration_bounds = array<i64: 2, 2, 1>, scalar_prefetch = 0 : i64, scratch_operands = 2 : i64, tpu.core_type = #tpu.core_type<tc>, window_params = [{transform_indices = @transform_0, window_bounds = array<i64: 1, 128, 4>}, {pipeline_mode = #tpu.pipeline_mode<synchronous>, transform_indices = @transform_1, window_bounds = array<i64: 2, 4, 16>}, {transform_indices = @transform_2, window_bounds = array<i64: 1, 1, 2, 8>}]} {
    %c0_i32 = arith.constant 0 : i32
    %0 = arith.cmpi eq, %arg2, %c0_i32 : i32
    %1 = arith.extui %0 : i1 to i32
    %c0_i32_0 = arith.constant 0 : i32
    %2 = arith.cmpi ne, %1, %c0_i32_0 : i32
    scf.if %2 {
      %cst_25 = arith.constant 0.000000e+00 : f32
      %49 = vector.broadcast %cst_25 : f32 to vector<1x8xf32>
      %c0_26 = arith.constant 0 : index
      %c0_27 = arith.constant 0 : index
      %50 = vector.load %arg6[%c0_26, %c0_27] : memref<1x8xf32, #tpu.memory_space<vmem>>, vector<1x8xf32>
      tpu.vector_store %arg6[%c0_26, %c0_27], %49 {strides = array<i32>} : memref<1x8xf32, #tpu.memory_space<vmem>>, vector<1x8xf32>,
      %cst_28 = arith.constant 0.000000e+00 : f32
      %51 = vector.broadcast %cst_28 : f32 to vector<1x8xf32>
      %c0_29 = arith.constant 0 : index
      %c0_30 = arith.constant 0 : index
      %52 = vector.load %arg7[%c0_29, %c0_30] : memref<1x8xf32, #tpu.memory_space<vmem>>, vector<1x8xf32>
      tpu.vector_store %arg7[%c0_29, %c0_30], %51 {strides = array<i32>} : memref<1x8xf32, #tpu.memory_space<vmem>>, vector<1x8xf32>,
    } else {
    }
    %c0 = arith.constant 0 : index
    %c0_1 = arith.constant 0 : index
    %c0_2 = arith.constant 0 : index
    %3 = vector.load %arg3[%c0, %c0_1, %c0_2] : memref<1x128x4xf32, #tpu.memory_space<vmem>>, vector<1x128x4xf32>
    %4 = vector.shape_cast %3 : vector<1x128x4xf32> to vector<128x4xf32>
    %5 = arith.truncf %4 : vector<128x4xf32> to vector<128x4xbf16>
    %cst = arith.constant 0.000000e+00 : f32
    %6 = vector.broadcast %cst : f32 to vector<1x8xf32>
    %cst_3 = arith.constant 0.000000e+00 : f32
    %7 = vector.broadcast %cst_3 : f32 to vector<1x8xf32>
    %c0_4 = arith.constant 0 : index
    %c0_5 = arith.constant 0 : index
    %c0_6 = arith.constant 0 : index
    %8 = vector.load %arg4[%c0_4, %c0_5, %c0_6] : memref<2x4x16xbf16, #tpu.memory_space<vmem>>, vector<1x4x16xbf16>
    %9 = vector.shape_cast %8 : vector<1x4x16xbf16> to vector<4x16xbf16>
    %cst_7 = arith.constant dense<0.000000e+00> : vector<128x16xf32>
    %10 = tpu.matmul %5, %9, %cst_7 {dimension_numbers = #tpu.dot_dimension_numbers<[1], [0], [0], [1], [0, 0, 1, 1], [], []>} : vector<128x4xbf16>, vector<4x16xbf16>, vector<128x16xf32> -> vector<128x16xf32>
    %cst_8 = arith.constant dense<0.000000e+00> : vector<16xf32>
    %11 = vector.multi_reduction <add>, %10, %cst_8 [0] : vector<128x16xf32> to vector<16xf32>
    %12 = vector.shape_cast %11 : vector<16xf32> to vector<1x16xf32>
    %13 = arith.mulf %10, %10 : vector<128x16xf32>
    %cst_9 = arith.constant dense<0.000000e+00> : vector<16xf32>
    %14 = vector.multi_reduction <add>, %13, %cst_9 [0] : vector<128x16xf32> to vector<16xf32>
    %15 = vector.shape_cast %14 : vector<16xf32> to vector<1x16xf32>
    %16 = vector.extract_strided_slice %12 {offsets = [0, 0], sizes = [1, 8], strides = [1, 1]} : vector<1x16xf32> to vector<1x8xf32>
    %17 = arith.addf %6, %16 : vector<1x8xf32>
    %18 = vector.extract_strided_slice %12 {offsets = [0, 8], sizes = [1, 8], strides = [1, 1]} : vector<1x16xf32> to vector<1x8xf32>
    %19 = arith.addf %17, %18 : vector<1x8xf32>
    %20 = vector.extract_strided_slice %15 {offsets = [0, 0], sizes = [1, 8], strides = [1, 1]} : vector<1x16xf32> to vector<1x8xf32>
    %21 = arith.addf %7, %20 : vector<1x8xf32>
    %22 = vector.extract_strided_slice %15 {offsets = [0, 8], sizes = [1, 8], strides = [1, 1]} : vector<1x16xf32> to vector<1x8xf32>
    %23 = arith.addf %21, %22 : vector<1x8xf32>
    %c1 = arith.constant 1 : index
    %c0_10 = arith.constant 0 : index
    %c0_11 = arith.constant 0 : index
    %24 = vector.load %arg4[%c1, %c0_10, %c0_11] : memref<2x4x16xbf16, #tpu.memory_space<vmem>>, vector<1x4x16xbf16>
    %25 = vector.shape_cast %24 : vector<1x4x16xbf16> to vector<4x16xbf16>
    %cst_12 = arith.constant dense<0.000000e+00> : vector<128x16xf32>
    %26 = tpu.matmul %5, %25, %cst_12 {dimension_numbers = #tpu.dot_dimension_numbers<[1], [0], [0], [1], [0, 0, 1, 1], [], []>} : vector<128x4xbf16>, vector<4x16xbf16>, vector<128x16xf32> -> vector<128x16xf32>
    %cst_13 = arith.constant dense<0.000000e+00> : vector<16xf32>
    %27 = vector.multi_reduction <add>, %26, %cst_13 [0] : vector<128x16xf32> to vector<16xf32>
    %28 = vector.shape_cast %27 : vector<16xf32> to vector<1x16xf32>
    %29 = arith.mulf %26, %26 : vector<128x16xf32>
    %cst_14 = arith.constant dense<0.000000e+00> : vector<16xf32>
    %30 = vector.multi_reduction <add>, %29, %cst_14 [0] : vector<128x16xf32> to vector<16xf32>
    %31 = vector.shape_cast %30 : vector<16xf32> to vector<1x16xf32>
    %32 = vector.extract_strided_slice %28 {offsets = [0, 0], sizes = [1, 8], strides = [1, 1]} : vector<1x16xf32> to vector<1x8xf32>
    %33 = arith.addf %19, %32 : vector<1x8xf32>
    %34 = vector.extract_strided_slice %28 {offsets = [0, 8], sizes = [1, 8], strides = [1, 1]} : vector<1x16xf32> to vector<1x8xf32>
    %35 = arith.addf %33, %34 : vector<1x8xf32>
    %36 = vector.extract_strided_slice %31 {offsets = [0, 0], sizes = [1, 8], strides = [1, 1]} : vector<1x16xf32> to vector<1x8xf32>
    %37 = arith.addf %23, %36 : vector<1x8xf32>
    %38 = vector.extract_strided_slice %31 {offsets = [0, 8], sizes = [1, 8], strides = [1, 1]} : vector<1x16xf32> to vector<1x8xf32>
    %39 = arith.addf %37, %38 : vector<1x8xf32>
    %c0_15 = arith.constant 0 : index
    %c0_16 = arith.constant 0 : index
    %40 = vector.load %arg6[%c0_15, %c0_16] : memref<1x8xf32, #tpu.memory_space<vmem>>, vector<1x8xf32>
    %41 = arith.addf %40, %35 : vector<1x8xf32>
    %c0_17 = arith.constant 0 : index
    %c0_18 = arith.constant 0 : index
    %42 = vector.load %arg6[%c0_17, %c0_18] : memref<1x8xf32, #tpu.memory_space<vmem>>, vector<1x8xf32>
    tpu.vector_store %arg6[%c0_17, %c0_18], %41 {strides = array<i32>} : memref<1x8xf32, #tpu.memory_space<vmem>>, vector<1x8xf32>,
    %c0_19 = arith.constant 0 : index
    %c0_20 = arith.constant 0 : index
    %43 = vector.load %arg7[%c0_19, %c0_20] : memref<1x8xf32, #tpu.memory_space<vmem>>, vector<1x8xf32>
    %44 = arith.addf %43, %39 : vector<1x8xf32>
    %c0_21 = arith.constant 0 : index
    %c0_22 = arith.constant 0 : index
    %45 = vector.load %arg7[%c0_21, %c0_22] : memref<1x8xf32, #tpu.memory_space<vmem>>, vector<1x8xf32>
    tpu.vector_store %arg7[%c0_21, %c0_22], %44 {strides = array<i32>} : memref<1x8xf32, #tpu.memory_space<vmem>>, vector<1x8xf32>,
    %c0_i32_23 = arith.constant 0 : i32
    %46 = arith.cmpi eq, %arg2, %c0_i32_23 : i32
    %47 = arith.extui %46 : i1 to i32
    %c0_i32_24 = arith.constant 0 : i32
    %48 = arith.cmpi ne, %47, %c0_i32_24 : i32
    scf.if %48 {
      %c0_25 = arith.constant 0 : index
      %c0_26 = arith.constant 0 : index
      %49 = vector.load %arg6[%c0_25, %c0_26] : memref<1x8xf32, #tpu.memory_space<vmem>>, vector<1x8xf32>
      %c0_27 = arith.constant 0 : index
      %c0_28 = arith.constant 0 : index
      %c0_29 = arith.constant 0 : index
      %c0_30 = arith.constant 0 : index
      %50 = vector.load %arg5[%c0_27, %c0_28, %c0_29, %c0_30] : memref<1x1x2x8xf32, #tpu.memory_space<vmem>>, vector<1x1x1x8xf32>
      %51 = vector.shape_cast %50 : vector<1x1x1x8xf32> to vector<1x8xf32>
      %52 = vector.shape_cast %49 : vector<1x8xf32> to vector<1x1x1x8xf32>
      tpu.vector_store %arg5[%c0_27, %c0_28, %c0_29, %c0_30], %52 {strides = array<i32>} : memref<1x1x2x8xf32, #tpu.memory_space<vmem>>, vector<1x1x1x8xf32>,
      %c0_31 = arith.constant 0 : index
      %c0_32 = arith.constant 0 : index
      %53 = vector.load %arg7[%c0_31, %c0_32] : memref<1x8xf32, #tpu.memory_space<vmem>>, vector<1x8xf32>
      %c0_33 = arith.constant 0 : index
      %c0_34 = arith.constant 0 : index
      %c1_35 = arith.constant 1 : index
      %c0_36 = arith.constant 0 : index
      %54 = vector.load %arg5[%c0_33, %c0_34, %c1_35, %c0_36] : memref<1x1x2x8xf32, #tpu.memory_space<vmem>>, vector<1x1x1x8xf32>
      %55 = vector.shape_cast %54 : vector<1x1x1x8xf32> to vector<1x8xf32>
      %56 = vector.shape_cast %53 : vector<1x8xf32> to vector<1x1x1x8xf32>
      tpu.vector_store %arg5[%c0_33, %c0_34, %c1_35, %c0_36], %56 {strides = array<i32>} : memref<1x1x2x8xf32, #tpu.memory_space<vmem>>, vector<1x1x1x8xf32>,
    } else {
    }
    return
  }
  func.func @transform_0(%arg0: i32, %arg1: i32, %arg2: i32) -> (i32, i32, i32) {
    %c1_i32 = arith.constant 1 : i32
    %0 = arith.muli %arg1, %c1_i32 : i32
    %1 = arith.addi %0, %arg2 : i32
    %c0_i32 = arith.constant 0 : i32
    %c0_i32_0 = arith.constant 0 : i32
    return %arg0, %1, %c0_i32 : i32, i32, i32
  }
  func.func @transform_1(%arg0: i32, %arg1: i32, %arg2: i32) -> (i32, i32, i32) {
    %c0_i32 = arith.constant 0 : i32
    %c0_i32_0 = arith.constant 0 : i32
    %c0_i32_1 = arith.constant 0 : i32
    %c0_i32_2 = arith.constant 0 : i32
    return %c0_i32, %c0_i32_0, %c0_i32_1 : i32, i32, i32
  }
  func.func @transform_2(%arg0: i32, %arg1: i32, %arg2: i32) -> (i32, i32, i32, i32) {
    %c0_i32 = arith.constant 0 : i32
    %c0_i32_0 = arith.constant 0 : i32
    %c0_i32_1 = arith.constant 0 : i32
    return %arg0, %arg1, %c0_i32, %c0_i32_0 : i32, i32, i32, i32
  }
}

</mosaic_0001>

<bundles_post_ra>
// kernel: tpu_custom_call.1
= control target key start
LH: loop header
LB: loop body
LE: loop exit
PB: predicated region body
PF: predicated region fallthrough
CT: control target
= control target key end

     0   :  { %7 = vsyncpa [#allocation5], 0  ;;  %s1283_s0 = inlined_call_operand.vmem [shape: f32[2,256,4], index: 0, kind: input, shape index: {}]   ;;  %s1284_s1 = inlined_call_operand.vmem [shape: bf16[2,4,16], index: 1, kind: input, shape index: {}]   ;;  %s1285_s2 = inlined_call_operand.hbm [shape: f32[2,2,2,8], index: 2, kind: output, shape index: {}]  }
   0x1   :  { %9 = vsyncpa [#allocation5 + $0x1], 0  ;;  %s1037_s9 = smov 0   ;;  %s1039_s10 = smov 0  }
   0x2   :  { %s1041_s11 = smov 0   ;;  %s1043_s12 = smov 0  }
   0x3   :  { %s1045_s13 = smov 0   ;;  %s1047_s14 = smov 0  }
   0x4   :  { %s1049_s15 = smov 0   ;;  %s1051_s16 = smov 0  }
   0x5 LB: > { %s763_s17 = sadd.s32 4294967295, %s1017_s16   ;;  %s764_s18 = sadd.s32 4294967294, %s1017_s16   ;;  %s1017_s16 = sphi %s1051_s16, %s15_s16   ;;  %s1013_s15 = sphi %s1049_s15, %s1294_s15   ;;  %s1009_s14 = sphi %s1047_s14, %s1293_s14   ;;  %s1005_s13 = sphi %s1045_s13, %s1292_s13   ;;  %s1001_s12 = sphi %s1043_s12, %s1291_s12   ;;  %s997_s11 = sphi %s1041_s11, %s1290_s11   ;;  %s993_s10 = sphi %s1039_s10, %s1289_s10   ;;  %s989_s9 = sphi %s1037_s9, %s1288_s9  }
   0x6   : > { %s30_s19 = sadd.s32 1, %s1009_s14  ;;  %s34_s20 = sadd.s32 1, %s1013_s15 }
   0x7   : > { %p32_p0 = scmp.ge.s32.totalorder %s30_s19, 2  ;;  %p104_p1 = scmp.ne.s32.totalorder %s997_s11, %s993_s10 }
   0x8   : > { %p105_p2 = scmp.eq.s32.totalorder %s763_s17, 3  ;;  %p110_p5 = scmp.ne.s32.totalorder %s993_s10, %s989_s9 }
   0x9   : > { %s1296_s19 = smov (%p32_p0, %s30_s19), 0  ;;  %s1298_s20 = smov (!%p32_p0, %s34_s20), %s1013_s15 }
   0xa   : > { %s90_s21 = ssub.s32 %s1009_s14, %s1296_s19  ;;  %p1088_p3 = por %p105_p2, %p104_p1 }
   0xb   : > { %p36_p4 = scmp.ge.s32.totalorder %s1298_s20, 2  ;;  %p111_p6 = scmp.eq.s32.totalorder %s764_s18, 3 }
   0xc   : > { %p767_p7 = scmp.ge.s32.totalorder %s1017_s16, 1  ;;  %p147_p9 = scmp.lt.s32.totalorder %s1017_s16, 5 }
   0xd   : > { %s1300_s20 = smov (%p36_p4, %s1298_s20), 0  ;;  %p1097_p8 = por %p111_p6, %p110_p5 }
   0xe   : > { %s89_s24 = ssub.s32 %s1013_s15, %s1300_s20  ;;  %s94_s25 = sadd.s32 1, %s997_s11 }
   0xf   : > { %s91_s26 = sor.u32 %s90_s21, %s89_s24  ;;  %p148_p10 = pnand %p767_p7, %p147_p9 }
  0x10   : > { %p92_p11 = scmp.eq.s32.totalorder %s91_s26, 0  ;;  %v218_v0 = vld [vmem:[%s1284_s1] sm:$0x3] (!%p148_p10)  ;;  %vm244_vm0 = vcmask (!%p148_p10), 1041408   ;;  %v780_v1 = vld [vmem:[%s1284_s1 + $0x2] sm:$0x3] (!%p148_p10) }
  0x11   : > { %151 = sbr.rel (%p148_p10) target bundleno = 446 (0x1be), region = 28  ;;  %s769_s4 = sshll.u32 (!%p148_p10), %s1001_s12, 4  ;;  %848 = vmatprep.subr.msk.bf16.mxu0 (!%p148_p10), %vm244_vm0, %v218_v0  ;;  %849 = vmatprep.subr.msk.bf16.mxu1 (!%p148_p10), %vm244_vm0, %v780_v1  ;;  %v246_v2 = vsel (!%p148_p10), %vm244_vm0, %v218_v0, 0  ;;  %v451_v3 = vsel (!%p148_p10), %vm244_vm0, %v780_v1, 0  ;;  %vm219_vm1 = vcmask (!%p148_p10), 31744   ;;  %vm345_vm2 = vcmask (!%p148_p10), 130048  }
  0x12   : > { %s1106_s27 = scalar_select %p92_p11, %s997_s11, %s94_s25  }
  0x13   : > { %p176_p12 = scmp.lt.s32.totalorder (!%p148_p10), %s1005_s13, 1  ;;  %p178_p13 = scmp.lt.s32.totalorder (!%p148_p10), %s769_s4, 31  ;;  %813 = vmatpush3.bf16.msra.mxu0 (!%p148_p10), %v246_v2  ;;  %831 = vmatpush3.bf16.msra.mxu1 (!%p148_p10), %v451_v3  ;;  %vm191_vm3 = vcmask (!%p148_p10), 57344  }
  0x14   : > { %s1020_s24 = smov (!%p148_p10), 120   ;;  %s171_s25 = sand.u32 (!%p148_p10), 1, %s993_s10  }
  0x15   : > { %s790_s26 = sshll.u32 (!%p148_p10), %s1005_s13, 1  ;;  %s768_s28 = sshll.u32 (!%p148_p10), %s171_s25, 1 }
  0x16   : > { %s678_s29 = sadd.s32 (!%p148_p10), %s1001_s12, %s790_s26  ;;  %s173_s3 = scalar_lea.vmem (!%p148_p10), [#allocation4], %s768_s28 }
  0x17   : > { %s791_s30 = sshll.u32 (!%p148_p10), %s678_s29, 5  ;;  %s667_s12 = scalar_lea.sflag (!%p148_p10), [#allocation5], %s171_s25 }
  0x18   : > { %s177_s5 = scalar_select %p176_p12, %s1005_s13, 1 }
  0x19   : > { %s1302_s4 = smov (!%p178_p13, %s769_s4), 31 }
  0x1a   : > { %s770_s6 = sshll.u32 %s177_s5, 5 }
  0x1b   : > { %s181_s7 = sadd.s32 %s770_s6, %s1302_s4  ;;  %s682_s4 = sshll.u32 %s173_s3, 4  ;;  %s1231_s4 = int_to_ptr.vmem [resolvable:$true] %s682_s4 }
  0x1c   : > { %s771_s8 = sshll.u32 %s181_s7, 3  ;;  %s1229_s7 = scalar_lea.hbm %s1285_s2, %s791_s30 }
  0x1d   : > { %s1120_s21 = scalar_lea.vmem %s1283_s0, %s771_s8  ;;  %s923_s13 = scalar_lea.vmem %s1231_s4, 32 }
  0x1e   : > { %v194_v4 = vld [vmem:[%s1120_s21] sm:$0xff]  ;;  %v195_v5 = vld [vmem:[%s1120_s21 + $0x8] sm:$0xff]  ;;  %v196_v6 = vld [vmem:[%s1120_s21 + $0x10] sm:$0xff]  ;;  %p924_p0 = scmp.ne.s32.totalorder %s1231_s4, %s923_s13  ;;  %s1021_s8 = smov [#allocation4]  }
  0x1f   : > { %v210_v7 = vpack.c.bf16 %v195_v5, %v194_v4  ;;  %v197_v8 = vld [vmem:[%s1120_s21 + $0x18] sm:$0xff]  ;;  %v198_v9 = vld [vmem:[%s1120_s21 + $0x20] sm:$0xff]  ;;  %v199_v10 = vld [vmem:[%s1120_s21 + $0x28] sm:$0xff]  ;;  %s927_s17 = sshll.u32 %s1021_s8, 4  ;;  %s928_s17 = int_to_ptr.vmem [resolvable:$false] %s927_s17 }
  0x20   : > { %v211_v11 = vpack.c.bf16 %v197_v8, %v196_v6  ;;  %v212_v12 = vpack.c.bf16 %v199_v10, %v198_v9  ;;  %v200_v13 = vld [vmem:[%s1120_s21 + $0x30] sm:$0xff]  ;;  %v201_v14 = vld [vmem:[%s1120_s21 + $0x38] sm:$0xff]  ;;  %v202_v15 = vld [vmem:[%s1120_s21 + $0x40] sm:$0xff]  ;;  %p925_p1 = pnand %p924_p0, %p1088_p3  ;;  %s929_s18 = scalar_lea.vmem %s928_s17, 64 }
  0x21   : > { %814 = vmatprep.mubr.msk.bf16.mxu0 %vm219_vm1, %v210_v7  ;;  %832 = vmatprep.mubr.msk.bf16.mxu1 %vm219_vm1, %v210_v7  ;;  %v203_v16 = vld [vmem:[%s1120_s21 + $0x48] sm:$0xff]  ;;  %v213_v17 = vpack.c.bf16 %v201_v14, %v200_v13  ;;  %v204_v19 = vld [vmem:[%s1120_s21 + $0x50] sm:$0xff]  ;;  %v205_v20 = vld [vmem:[%s1120_s21 + $0x58] sm:$0xff]  ;;  %p930_p4 = scmp.lt.s32.totalorder %s1231_s4, %s928_s17  ;;  %p931_p5 = scmp.lt.s32.totalorder %s929_s18, %s923_s13 }
  0x22   : > { %815 = vmatmul.mubr.msk.bf16.vlgmr.msra.gmra.mrb[0].mxu0 %vm219_vm1, %v211_v11  ;;  %833 = vmatmul.mubr.msk.bf16.vlgmr.msra.gmra.mrb[0].mxu1 %vm219_vm1, %v211_v11  ;;  %v214_v18 = vpack.c.bf16 %v203_v16, %v202_v15  ;;  %v206_v21 = vld [vmem:[%s1120_s21 + $0x60] sm:$0xff]  ;;  %v207_v22 = vld [vmem:[%s1120_s21 + $0x68] sm:$0xff]  ;;  %v215_v23 = vpack.c.bf16 %v205_v20, %v204_v19  ;;  %v208_v25 = vld [vmem:[%s1120_s21 + $0x70] sm:$0xff]  ;;  %p926_p2 = pneg %p925_p1 }
  0x23   : > { %818 = vmatprep.mubr.msk.bf16.mxu0 %vm219_vm1, %v212_v12  ;;  %836 = vmatprep.mubr.msk.bf16.mxu1 %vm219_vm1, %v212_v12  ;;  %v216_v24 = vpack.c.bf16 %v207_v22, %v206_v21  ;;  %v209_v26 = vld [vmem:[%s1120_s21 + $0x78] sm:$0xff]  ;;  %p932_p6 = por %p931_p5, %p930_p4 }
  0x24   : > { %v217_v27 = vpack.c.bf16 %v209_v26, %v208_v25 }
  0x25   : > { %p933_p7 = pnand %p932_p6, %p926_p2 }
  0x2a   : > { %819 = vmatmul.mubr.msk.bf16.gmra.mrb[4].mxu0 %vm219_vm1, %v213_v17  ;;  %837 = vmatmul.mubr.msk.bf16.gmra.mrb[4].mxu1 %vm219_vm1, %v213_v17 }
  0x2b   : > { %822 = vmatprep.mubr.msk.bf16.mxu0 %vm219_vm1, %v214_v18  ;;  %840 = vmatprep.mubr.msk.bf16.mxu1 %vm219_vm1, %v214_v18 }
  0x32   : > { %823 = vmatmul.mubr.msk.bf16.gmra.mrb[8].mxu0 %vm219_vm1, %v215_v23  ;;  %841 = vmatmul.mubr.msk.bf16.gmra.mrb[8].mxu1 %vm219_vm1, %v215_v23 }
  0x33   : > { %826 = vmatprep.mubr.msk.bf16.mxu0 %vm219_vm1, %v216_v24  ;;  %844 = vmatprep.mubr.msk.bf16.mxu1 %vm219_vm1, %v216_v24 }
  0x3a   : > { %827 = vmatmul.mubr.msk.bf16.gmra.mrb[12].mxu0 %vm219_vm1, %v217_v27  ;;  %845 = vmatmul.mubr.msk.bf16.gmra.mrb[12].mxu1 %vm219_vm1, %v217_v27 }
  0xf5   : > { %v816_v28 = vpop.f32.mrb[0].mxu0  ;;  %v834_v29 = vpop.f32.mrb[0].mxu1 }
  0xf6   : > { %v589_v30 = vmul.f32 %v834_v29, %v834_v29  ;;  %v282_v31 = vpop.f32.mrb[1].mxu0  ;;  %v487_v32 = vpop.f32.mrb[1].mxu1  ;;  %v349_v40 = vsel %vm345_vm2, %v816_v28, 0.0  ;;  %v385_v41 = vmul.f32 %v816_v28, %v816_v28  ;;  %v553_v42 = vsel %vm345_vm2, %v834_v29, 0.0 }
  0xf7   : > { %v587_v33 = vmul.f32 %v487_v32, %v487_v32  ;;  %v817_v34 = vpop.f32.mrb[2].mxu0  ;;  %v835_v35 = vpop.f32.mrb[2].mxu1  ;;  %v383_v36 = vmul.f32 %v282_v31, %v282_v31  ;;  %v550_v37 = vsel %vm345_vm2, %v487_v32, 0.0  ;;  %v346_v43 = vsel %vm345_vm2, %v282_v31, 0.0 }
  0xf8   : > { %v285_v38 = vpop.f32.mrb[3].mxu0  ;;  %v490_v39 = vpop.f32.mrb[3].mxu1  ;;  %v606_v44 = vsel %vm345_vm2, %v589_v30, 0.0  ;;  %v386_v53 = vmul.f32 %v817_v34, %v817_v34  ;;  %v590_v54 = vmul.f32 %v835_v35, %v835_v35  ;;  %v402_v62 = vsel %vm345_vm2, %v385_v41, 0.0 }
  0xf9   : > { %v347_v45 = vsel %vm345_vm2, %v285_v38, 0.0  ;;  %v384_v46 = vmul.f32 %v285_v38, %v285_v38  ;;  %v551_v47 = vsel %vm345_vm2, %v490_v39, 0.0  ;;  %v603_v48 = vsel %vm345_vm2, %v587_v33, 0.0 }
  0xfa   : > { %v348_v49 = vadd.f32 %v347_v45, %v346_v43  ;;  %v552_v50 = vadd.f32 %v551_v47, %v550_v37  ;;  %v588_v51 = vmul.f32 %v490_v39, %v490_v39  ;;  %v399_v52 = vsel %vm345_vm2, %v383_v36, 0.0 }
  0xfb   : > { %v400_v55 = vsel %vm345_vm2, %v384_v46, 0.0  ;;  %v351_v63 = vsel %vm345_vm2, %v817_v34, 0.0  ;;  %v555_v3 = vsel %vm345_vm2, %v835_v35, 0.0  ;;  %v404_v9 = vsel %vm345_vm2, %v386_v53, 0.0 }
  0xfc   : > { %v350_v56 = vadd.f32 %v349_v40, %v348_v49  ;;  %v401_v57 = vadd.f32 %v400_v55, %v399_v52  ;;  %v554_v58 = vadd.f32 %v553_v42, %v552_v50  ;;  %v604_v59 = vsel %vm345_vm2, %v588_v51, 0.0 }
  0xfd   : > { %v820_v60 = vpop.f32.mrb[4].mxu0  ;;  %v838_v61 = vpop.f32.mrb[4].mxu1  ;;  %v605_v0 = vadd.f32 %v604_v59, %v603_v48  ;;  %v608_v15 = vsel %vm345_vm2, %v590_v54, 0.0 }
  0xfe   : > { %v298_v1 = vpop.f32.mrb[5].mxu0  ;;  %v503_v2 = vpop.f32.mrb[5].mxu1  ;;  %v403_v4 = vadd.f32 %v402_v62, %v401_v57  ;;  %v352_v5 = vadd.f32 %v351_v63, %v350_v56  ;;  %v556_v12 = vadd.f32 %v555_v3, %v554_v58  ;;  %v357_v23 = vsel %vm345_vm2, %v820_v60, 0.0 }
  0xff   : > { %v353_v6 = vsel %vm345_vm2, %v298_v1, 0.0  ;;  %v821_v7 = vpop.f32.mrb[6].mxu0  ;;  %v839_v8 = vpop.f32.mrb[6].mxu1  ;;  %v607_v10 = vadd.f32 %v606_v44, %v605_v0  ;;  %v387_v11 = vmul.f32 %v298_v1, %v298_v1  ;;  %v557_v18 = vsel %vm345_vm2, %v503_v2, 0.0 }
 0x100   : > { %v301_v13 = vpop.f32.mrb[7].mxu0  ;;  %v506_v14 = vpop.f32.mrb[7].mxu1  ;;  %v354_v16 = vadd.f32 %v353_v6, %v352_v5  ;;  %v405_v17 = vadd.f32 %v404_v9, %v403_v4  ;;  %v558_v20 = vadd.f32 %v557_v18, %v556_v12  ;;  %v591_v21 = vmul.f32 %v503_v2, %v503_v2 }
 0x101   : > { %v406_v19 = vsel %vm345_vm2, %v387_v11, 0.0  ;;  %v609_v22 = vadd.f32 %v608_v15, %v607_v10  ;;  %v389_v24 = vmul.f32 %v820_v60, %v820_v60  ;;  %v593_v25 = vmul.f32 %v838_v61, %v838_v61 }
 0x102   : > { %v407_v26 = vadd.f32 %v406_v19, %v405_v17  ;;  %v561_v27 = vsel %vm345_vm2, %v838_v61, 0.0  ;;  %v610_v28 = vsel %vm345_vm2, %v591_v21, 0.0  ;;  %v355_v29 = vsel %vm345_vm2, %v301_v13, 0.0 }
 0x103   : > { %v388_v30 = vmul.f32 %v301_v13, %v301_v13  ;;  %v611_v31 = vadd.f32 %v610_v28, %v609_v22  ;;  %v390_v32 = vmul.f32 %v821_v7, %v821_v7  ;;  %v356_v33 = vadd.f32 %v355_v29, %v354_v16 }
 0x104   : > { %v559_v34 = vsel %vm345_vm2, %v506_v14, 0.0  ;;  %v594_v37 = vmul.f32 %v839_v8, %v839_v8  ;;  %v592_v40 = vmul.f32 %v506_v14, %v506_v14  ;;  %v410_v43 = vsel %vm345_vm2, %v389_v24, 0.0 }
 0x105   : > { %v824_v35 = vpop.f32.mrb[8].mxu0  ;;  %v842_v36 = vpop.f32.mrb[8].mxu1  ;;  %v408_v38 = vsel %vm345_vm2, %v388_v30, 0.0  ;;  %v560_v39 = vadd.f32 %v559_v34, %v558_v20  ;;  %v614_v44 = vsel %vm345_vm2, %v593_v25, 0.0  ;;  %v358_v45 = vadd.f32 %v357_v23, %v356_v33 }
 0x106   : > { %v314_v41 = vpop.f32.mrb[9].mxu0  ;;  %v519_v42 = vpop.f32.mrb[9].mxu1  ;;  %v409_v46 = vadd.f32 %v408_v38, %v407_v26  ;;  %v359_v49 = vsel %vm345_vm2, %v821_v7, 0.0  ;;  %v563_v50 = vsel %vm345_vm2, %v839_v8, 0.0  ;;  %v612_v52 = vsel %vm345_vm2, %v592_v40, 0.0 }
 0x107   : > { %v825_v47 = vpop.f32.mrb[10].mxu0  ;;  %v843_v48 = vpop.f32.mrb[10].mxu1  ;;  %v562_v51 = vadd.f32 %v561_v27, %v560_v39  ;;  %v412_v55 = vsel %vm345_vm2, %v390_v32, 0.0  ;;  %v613_v57 = vadd.f32 %v612_v52, %v611_v31  ;;  %v360_v58 = vadd.f32 %v359_v49, %v358_v45 }
 0x108   : > { %v317_v53 = vpop.f32.mrb[11].mxu0  ;;  %v522_v54 = vpop.f32.mrb[11].mxu1  ;;  %v411_v56 = vadd.f32 %v410_v43, %v409_v46  ;;  %v616_v59 = vsel %vm345_vm2, %v594_v37, 0.0  ;;  %v361_v60 = vsel %vm345_vm2, %v314_v41, 0.0  ;;  %v391_v61 = vmul.f32 %v314_v41, %v314_v41 }
 0x109   : > { %v564_v62 = vadd.f32 %v563_v50, %v562_v51  ;;  %v615_v63 = vadd.f32 %v614_v44, %v613_v57  ;;  %v362_v0 = vadd.f32 %v361_v60, %v360_v58  ;;  %v565_v2 = vsel %vm345_vm2, %v519_v42, 0.0 }
 0x10a   : > { %v413_v1 = vadd.f32 %v412_v55, %v411_v56  ;;  %v393_v3 = vmul.f32 %v824_v35, %v824_v35  ;;  %v414_v4 = vsel %vm345_vm2, %v391_v61, 0.0  ;;  %v595_v6 = vmul.f32 %v519_v42, %v519_v42 }
 0x10b   : > { %v566_v5 = vadd.f32 %v565_v2, %v564_v62  ;;  %v365_v7 = vsel %vm345_vm2, %v824_v35, 0.0  ;;  %v597_v8 = vmul.f32 %v842_v36, %v842_v36  ;;  %v617_v10 = vadd.f32 %v616_v59, %v615_v63 }
 0x10c   : > { %v415_v9 = vadd.f32 %v414_v4, %v413_v1  ;;  %v569_v13 = vsel %vm345_vm2, %v842_v36, 0.0  ;;  %v618_v14 = vsel %vm345_vm2, %v595_v6, 0.0  ;;  %v363_v15 = vsel %vm345_vm2, %v317_v53, 0.0 }
 0x10d   : > { %v828_v11 = vpop.f32.mrb[12].mxu0  ;;  %v846_v12 = vpop.f32.mrb[12].mxu1  ;;  %v392_v16 = vmul.f32 %v317_v53, %v317_v53  ;;  %v619_v19 = vadd.f32 %v618_v14, %v617_v10  ;;  %v394_v20 = vmul.f32 %v825_v47, %v825_v47  ;;  %v364_v21 = vadd.f32 %v363_v15, %v362_v0 }
 0x10e   : > { %v330_v17 = vpop.f32.mrb[13].mxu0  ;;  %v535_v18 = vpop.f32.mrb[13].mxu1  ;;  %v567_v22 = vsel %vm345_vm2, %v522_v54, 0.0  ;;  %v418_v25 = vsel %vm345_vm2, %v393_v3, 0.0  ;;  %v596_v28 = vmul.f32 %v522_v54, %v522_v54  ;;  %v622_v31 = vsel %vm345_vm2, %v597_v8, 0.0 }
 0x10f   : > { %v829_v23 = vpop.f32.mrb[14].mxu0  ;;  %v847_v24 = vpop.f32.mrb[14].mxu1  ;;  %v416_v26 = vsel %vm345_vm2, %v392_v16, 0.0  ;;  %v568_v27 = vadd.f32 %v567_v22, %v566_v5  ;;  %v367_v32 = vsel %vm345_vm2, %v825_v47, 0.0  ;;  %v366_v33 = vadd.f32 %v365_v7, %v364_v21 }
 0x110   : > { %v333_v29 = vpop.f32.mrb[15].mxu0  ;;  %v538_v30 = vpop.f32.mrb[15].mxu1  ;;  %v417_v34 = vadd.f32 %v416_v26, %v415_v9  ;;  %v571_v35 = vsel %vm345_vm2, %v843_v48, 0.0  ;;  %v598_v36 = vmul.f32 %v843_v48, %v843_v48  ;;  %v620_v38 = vsel %vm345_vm2, %v596_v28, 0.0 }
 0x111   : > { %v570_v37 = vadd.f32 %v569_v13, %v568_v27  ;;  %v420_v39 = vsel %vm345_vm2, %v394_v20, 0.0  ;;  %v621_v41 = vadd.f32 %v620_v38, %v619_v19  ;;  %v368_v42 = vadd.f32 %v367_v32, %v366_v33 }
 0x112   : > { %v419_v40 = vadd.f32 %v418_v25, %v417_v34  ;;  %v397_v43 = vmul.f32 %v828_v11, %v828_v11  ;;  %v369_v44 = vsel %vm345_vm2, %v330_v17, 0.0  ;;  %v395_v45 = vmul.f32 %v330_v17, %v330_v17 }
 0x113   : > { %v572_v46 = vadd.f32 %v571_v35, %v570_v37  ;;  %v623_v49 = vadd.f32 %v622_v31, %v621_v41  ;;  %v370_v47 = vadd.f32 %v369_v44, %v368_v42  ;;  %v573_v51 = vsel %vm345_vm2, %v535_v18, 0.0 }
 0x114   : > { %v421_v50 = vadd.f32 %v420_v39, %v419_v40  ;;  %v624_v48 = vsel %vm345_vm2, %v598_v36, 0.0  ;;  %v422_v52 = vsel %vm345_vm2, %v395_v45, 0.0  ;;  %v599_v54 = vmul.f32 %v535_v18, %v535_v18 }
 0x115   : > { %v574_v53 = vadd.f32 %v573_v51, %v572_v46  ;;  %v373_v55 = vsel %vm345_vm2, %v828_v11, 0.0  ;;  %v601_v56 = vmul.f32 %v846_v12, %v846_v12  ;;  %v625_v58 = vadd.f32 %v624_v48, %v623_v49 }
 0x116   : > { %v423_v57 = vadd.f32 %v422_v52, %v421_v50  ;;  %v577_v59 = vsel %vm345_vm2, %v846_v12, 0.0  ;;  %v626_v60 = vsel %vm345_vm2, %v599_v54, 0.0  ;;  %v371_v61 = vsel %vm345_vm2, %v333_v29, 0.0 }
 0x117   : > { %v396_v62 = vmul.f32 %v333_v29, %v333_v29  ;;  %v426_v63 = vsel %vm345_vm2, %v397_v43, 0.0  ;;  %v627_v0 = vadd.f32 %v626_v60, %v625_v58  ;;  %v372_v1 = vadd.f32 %v371_v61, %v370_v47 }
 0x118   : > { %v575_v2 = vsel %vm345_vm2, %v538_v30, 0.0  ;;  %v398_v3 = vmul.f32 %v829_v23, %v829_v23  ;;  %v600_v6 = vmul.f32 %v538_v30, %v538_v30  ;;  %v630_v7 = vsel %vm345_vm2, %v601_v56, 0.0 }
 0x119   : > { %v424_v4 = vsel %vm345_vm2, %v396_v62, 0.0  ;;  %v576_v5 = vadd.f32 %v575_v2, %v574_v53  ;;  %v375_v8 = vsel %vm345_vm2, %v829_v23, 0.0  ;;  %v374_v9 = vadd.f32 %v373_v55, %v372_v1 }
 0x11a   : > { %v425_v10 = vadd.f32 %v424_v4, %v423_v57  ;;  %v579_v11 = vsel %vm345_vm2, %v847_v24, 0.0  ;;  %v602_v12 = vmul.f32 %v847_v24, %v847_v24  ;;  %v628_v14 = vsel %vm345_vm2, %v600_v6, 0.0 }
 0x11b   : > { %v578_v13 = vadd.f32 %v577_v59, %v576_v5  ;;  %v376_v15 = vadd.f32 %v375_v8, %v374_v9  ;;  %v629_v17 = vadd.f32 %v628_v14, %v627_v0  ;;  %v428_v18 = vsel %vm345_vm2, %v398_v3, 0.0 }
 0x11c   : > { %v427_v16 = vadd.f32 %v426_v63, %v425_v10  ;;  %v1019_v25 = vmov 0.0   ;;  %v632_v23 = vsel %vm345_vm2, %v602_v12, 0.0 }
 0x11d   : > { %v580_v19 = vadd.f32 %v579_v11, %v578_v13  ;;  %v631_v21 = vadd.f32 %v630_v7, %v629_v17  ;;  %v377_v22 = vrot.slane %v376_v15, 4  ;;  %192 = vst.msk [vmem:[#allocation2] sm:$0x1] %vm191_vm3, %v1019_v25  ;;  %193 = vst.msk [vmem:[#allocation3] sm:$0x1] %vm191_vm3, %v1019_v25 }
 0x11e   : > { %v429_v20 = vadd.f32 %v428_v18, %v427_v16 }
 0x11f   : > { %v581_v24 = vrot.slane %v580_v19, 4  ;;  %v633_v27 = vadd.f32 %v632_v23, %v631_v21  ;;  %v378_v28 = vadd.f32 %v377_v22, %v376_v15 }
 0x120   : > { %v430_v26 = vrot.slane %v429_v20, 4 }
 0x121   : > { %v582_v29 = vadd.f32 %v581_v24, %v580_v19  ;;  %v634_v30 = vrot.slane %v633_v27, 4  ;;  %v379_v31 = vrot.slane %v378_v28, 2 }
 0x122   : > { %v431_v32 = vadd.f32 %v430_v26, %v429_v20 }
 0x123   : > { %v583_v33 = vrot.slane %v582_v29, 2  ;;  %v380_v34 = vadd.f32 %v379_v31, %v378_v28  ;;  %v635_v35 = vadd.f32 %v634_v30, %v633_v27 }
 0x124   : > { %v432_v36 = vrot.slane %v431_v32, 2  ;;  %v652_v53 = vld [vmem:[#allocation2] sm:$0x1]  ;;  %v656_v60 = vld [vmem:[#allocation3] sm:$0x1] }
 0x125   : > { %v584_v37 = vadd.f32 %v583_v33, %v582_v29  ;;  %v381_v38 = vrot.slane %v380_v34, 1  ;;  %v636_v39 = vrot.slane %v635_v35, 2 }
 0x126   : > { %v433_v40 = vadd.f32 %v432_v36, %v431_v32 }
 0x127   : > { %v585_v41 = vrot.slane %v584_v37, 1  ;;  %v382_v42 = vadd.f32 %v381_v38, %v380_v34  ;;  %v637_v43 = vadd.f32 %v636_v39, %v635_v35 }
 0x128   : > { %v434_v44 = vrot.slane %v433_v40, 1 }
 0x129   : > { %v586_v45 = vadd.f32 %v585_v41, %v584_v37  ;;  %438 = vrot.lane.b32.xlu0 %v382_v42, %s1020_s24  ;;  %v638_v46 = vrot.slane %v637_v43, 1 }
 0x12a   : > { %v435_v49 = vadd.f32 %v434_v44, %v433_v40 }
 0x12b   : > { %642 = vrot.lane.b32.xlu1 %v586_v45, %s1020_s24  ;;  %v639_v47 = vadd.f32 %v638_v46, %v637_v43 }
 0x12d   : > { %444 = vrot.lane.b32.xlu0 %v435_v49, %s1020_s24 }
 0x12f   : > { %648 = vrot.lane.b32.xlu1 %v639_v47, %s1020_s24 }
 0x19b   : > { %v439_v50 = vpop.permute.xlu0 %438 }
 0x19c   : > { %v441_v51 = vadd.f32 %v439_v50, %v382_v42 }
 0x19d   : > { %v643_v48 = vpop.permute.xlu1 %642 }
 0x19e   : > { %v640_v52 = vadd.f32 %v586_v45, %v441_v51 }
 0x19f   : > { %v445_v54 = vpop.permute.xlu0 %444 }
 0x1a0   : > { %v645_v55 = vadd.f32 %v643_v48, %v640_v52  ;;  %v447_v56 = vadd.f32 %v445_v54, %v435_v49 }
 0x1a1   : > { %v649_v59 = vpop.permute.xlu1 %648 }
 0x1a2   : > { %v653_v57 = vadd.f32 %v652_v53, %v645_v55  ;;  %v646_v58 = vadd.f32 %v639_v47, %v447_v56 }
 0x1a4   : > { %655 = vst.msk [vmem:[#allocation2] sm:$0x1] %vm191_vm3, %v653_v57  ;;  %v651_v61 = vadd.f32 %v649_v59, %v646_v58 }
 0x1a6   : > { %v657_v62 = vadd.f32 %v656_v60, %v651_v61 }
 0x1a8   : > { %658 = vst.msk [vmem:[#allocation3] sm:$0x1] %vm191_vm3, %v657_v62 }
 0x1ab   : > { %v662_v63 = vld [vmem:[#allocation2] sm:$0x1] }
 0x1ac   : > { %663 = vst.msk [vmem:[%s173_s3] sm:$0x1] %vm191_vm3, %v662_v63 }
 0x1af   : > { %v664_v0 = vld [vmem:[#allocation3] sm:$0x1] }
 0x1b0   : > { %665 = vst.msk [vmem:[%s173_s3 + $0x1] sm:$0x1] %vm191_vm3, %v664_v0 }
 0x1b1   : > { %936 = shalt.err (!%p933_p7)
}
 0x1b2   : > { %s937_s21 = scalar_lea.hbm %s1229_s7, 32  ;;  %s941_s26 = scalar_lea.hbm %s1285_s2, 128 }
 0x1b3   : > { %p938_p9 = scmp.ne.s32.totalorder %s1229_s7, %s937_s21  ;;  %p942_p12 = scmp.lt.u32.totalorder %s1229_s7, %s1285_s2 }
 0x1b4   : > { %p943_p13 = scmp.lt.u32.totalorder %s941_s26, %s937_s21  ;;  %p945_p1 = scmp.lt.u32.totalorder %s937_s21, %s1229_s7 }
 0x1b5   : > { %p939_p10 = pnand %p938_p9, %p1088_p3 }
 0x1b6   : > { %p944_p0 = por %p943_p13, %p942_p12 }
 0x1b7   : > { %p940_p11 = pneg %p939_p10 }
 0x1b8   : > { %p946_p2 = por %p945_p1, %p944_p0 }
 0x1ba   : > { %p947_p4 = pnand %p946_p2, %p940_p11 }
 0x1bc   : > { %950 = shalt.err (!%p947_p4)
}
 0x1bd   : > { %850 = dma.vmem_to_hbm [thread:$0]  (%p1088_p3), %s1231_s4, 32, %s1229_s7, %s667_s12  }
 0x1be PF: > { %p856_p5 = scmp.ge.s32.totalorder %s1017_s16, 2  ;;  %s694_s30 = sand.u32 1, %s989_s9  }
 0x1bf   : > { %s695_s3 = scalar_lea.sflag [#allocation5], %s694_s30 }
 0x1c0   : > { %p853_p6 = pnand %p856_p5, %p1097_p8 }
 0x1c2   : > { %984 = dma.done.wait (!%p853_p6), %s695_s3, 32  }
 0x1c3   : > { %986 = vsyncadd (!%p853_p6), %s695_s3, 4294967264  ;;  %s15_s16 = sadd.s32 1, %s1017_s16   ;;  %s1288_s9 = smov %s993_s10 }
 0x1c4   : > { %p12_p7 = scmp.ge.s32.totalorder %s15_s16, 6   ;;  %s1289_s10 = smov %s997_s11 }
 0x1c5   : > { %s1290_s11 = smov %s1106_s27  ;;  %s1291_s12 = smov %s1009_s14 }
 0x1c6   : > { %s1292_s13 = smov %s1013_s15  ;;  %s1293_s14 = smov %s1296_s19 }
 0x1c7   : > { %s1294_s15 = smov %s1300_s20  ;;  %14 = sbr.rel (!%p12_p7) target bundleno = 5 (0x5), region = 72 }
 0x1ce   :  { %700 = vsyncpa [#allocation5], 1 }
 0x1cf   :  { %702 = vsyncpa [#allocation5 + $0x1], 1 }

</bundles_post_ra>
